<compile_context>
chip_gen: v5e
topology: v5e:2x2
jax: 0.10.0
libtpu: 0.0.40
codegen_flags: <defaults>
</compile_context>

<pallas_src>
import functools

import jax
import jax.numpy as jnp
from jax.experimental import pallas as pl
from jax.experimental.pallas import tpu as pltpu

LANE = 128


def _round_up(v, m):
    return (v + m - 1) // m * m


# ---------------------------------------------------------------------------
# Stage 1: S1 = x @ W1      (row-tiled over nodes; lane-dense hidden axis)
# ---------------------------------------------------------------------------
def support1_kernel(x_ref, w1_ref, s1_ref):
    s1_ref[...] = jnp.dot(
        x_ref[...], w1_ref[...], preferred_element_type=jnp.float32
    ).astype(s1_ref.dtype)


# ---------------------------------------------------------------------------
# Stage 2: h = relu(adj_tile @ S1 + b1) ; S2_tile = h @ W2
#          (dropout is identity in inference mode)
# ---------------------------------------------------------------------------
def layer1_kernel(adj_ref, s1_ref, b1_ref, w2_ref, s2_ref):
    h = jnp.dot(adj_ref[...], s1_ref[...], preferred_element_type=jnp.float32)
    h = jnp.maximum(h + b1_ref[...], 0.0)  # bias + ReLU in f32
    # TODO(synk): add stochastic dropout via pltpu.prng_random_bits if a
    # training-mode forward is ever required (inference F.dropout = identity).
    s2_ref[...] = jnp.dot(
        h.astype(jnp.bfloat16), w2_ref[...], preferred_element_type=jnp.float32
    ).astype(s2_ref.dtype)


# ---------------------------------------------------------------------------
# Stage 3: out_tile = log_softmax(adj_tile @ S2 + b2) over the class axis
# ---------------------------------------------------------------------------
def layer2_kernel(adj_ref, s2_ref, b2_ref, o_ref, *, nclass):
    z = jnp.dot(adj_ref[...], s2_ref[...], preferred_element_type=jnp.float32)
    z = z + b2_ref[...]
    # Padded class columns must not participate in the softmax.
    col = jax.lax.broadcasted_iota(jnp.int32, z.shape, 1)
    z = jnp.where(col < nclass, z, -jnp.inf)
    m = jnp.max(z, axis=1, keepdims=True)
    s = z - m
    lse = jnp.log(jnp.sum(jnp.exp(s), axis=1, keepdims=True))
    o_ref[...] = (s - lse).astype(o_ref.dtype)


@jax.jit
def gcn_forward(x, adj, w1, b1, w2, b2):
    n, nfeat = x.shape
    nhid = w1.shape[1]
    nclass = w2.shape[1]

    hp = _round_up(nhid, LANE)   # lane-dense hidden axis
    cp = _round_up(nclass, LANE)  # lane-dense class axis

    # Row tile: large enough to amortize the ~0.35us per-grid-step overhead,
    # small enough that a (TM, N) adj stripe + full S1/S2 stay in VMEM.
    tm = 256 if n > 256 else _round_up(n, 16)
    n_pad = _round_up(n, tm)
    grid = (n_pad // tm,)

    f32 = jnp.float32
    bf16 = jnp.bfloat16

    # Zero-pad nodes / hidden / class dims. Padded W1/b1 columns are zero so
    # padded hidden units stay exactly zero through ReLU; padded class columns
    # are masked to -inf inside the log-softmax kernel.
    xp = jnp.zeros((n_pad, nfeat), f32).at[:n, :].set(x.astype(f32))
    adjp = jnp.zeros((n_pad, n_pad), f32).at[:n, :n].set(adj.astype(f32))
    w1p = jnp.zeros((nfeat, hp), f32).at[:, :nhid].set(w1)
    b1p = jnp.zeros((1, hp), f32).at[:, :nhid].set(b1)
    w2p = jnp.zeros((hp, cp), f32).at[:nhid, :nclass].set(w2)
    b2p = jnp.zeros((1, cp), f32).at[:, :nclass].set(b2)

    # bf16 operands into the MXU; accumulation stays f32 (preferred_element_type).
    x_bf = xp.astype(bf16)
    adj_bf = adjp.astype(bf16)
    w1_bf = w1p.astype(bf16)
    w2_bf = w2p.astype(bf16)

    cparams = pltpu.CompilerParams(
        dimension_semantics=("parallel",),   # megacore row-sharding on v7x
        vmem_limit_bytes=48 << 20,           # headroom inside v7x's 64 MiB VMEM
    )

    # TODO(synk): for very large graphs where the (n_pad, hp) S1 block or the
    # (tm, n_pad) adj stripe no longer fits VMEM, add a second grid axis over
    # adj column tiles with an f32 VMEM accumulator + pl.when init/finalize.

    # ---- stage 1: S1 = x @ W1 ----------------------------------------------
    s1 = pl.pallas_call(
        support1_kernel,
        out_shape=jax.ShapeDtypeStruct((n_pad, hp), bf16),
        grid=grid,
        in_specs=[
            pl.BlockSpec((tm, nfeat), lambda i: (i, 0)),
            pl.BlockSpec((nfeat, hp), lambda i: (0, 0)),
        ],
        out_specs=pl.BlockSpec((tm, hp), lambda i: (i, 0)),
        compiler_params=cparams,
        cost_estimate=pl.CostEstimate(
            flops=2 * n_pad * nfeat * hp,
            transcendentals=0,
            bytes_accessed=2 * (n_pad * nfeat + nfeat * hp + n_pad * hp),
        ),
    )(x_bf, w1_bf)

    # ---- stage 2: S2 = relu(adj @ S1 + b1) @ W2 -----------------------------
    s2 = pl.pallas_call(
        layer1_kernel,
        out_shape=jax.ShapeDtypeStruct((n_pad, cp), bf16),
        grid=grid,
        in_specs=[
            pl.BlockSpec((tm, n_pad), lambda i: (i, 0)),
            pl.BlockSpec((n_pad, hp), lambda i: (0, 0)),
            pl.BlockSpec((1, hp), lambda i: (0, 0)),
            pl.BlockSpec((hp, cp), lambda i: (0, 0)),
        ],
        out_specs=pl.BlockSpec((tm, cp), lambda i: (i, 0)),
        compiler_params=cparams,
        cost_estimate=pl.CostEstimate(
            flops=2 * n_pad * n_pad * hp + 2 * n_pad * hp * cp,
            transcendentals=0,
            bytes_accessed=2 * (n_pad * n_pad + n_pad * hp + hp * cp + n_pad * cp)
            + 4 * hp,
        ),
    )(adj_bf, s1, b1p, w2_bf)

    # ---- stage 3: out = log_softmax(adj @ S2 + b2, axis=1) ------------------
    out = pl.pallas_call(
        functools.partial(layer2_kernel, nclass=nclass),
        out_shape=jax.ShapeDtypeStruct((n_pad, cp), f32),
        grid=grid,
        in_specs=[
            pl.BlockSpec((tm, n_pad), lambda i: (i, 0)),
            pl.BlockSpec((n_pad, cp), lambda i: (0, 0)),
            pl.BlockSpec((1, cp), lambda i: (0, 0)),
        ],
        out_specs=pl.BlockSpec((tm, cp), lambda i: (i, 0)),
        compiler_params=cparams,
        cost_estimate=pl.CostEstimate(
            flops=2 * n_pad * n_pad * cp,
            transcendentals=n_pad * cp,
            bytes_accessed=2 * (n_pad * n_pad + n_pad * cp)
            + 4 * (cp + n_pad * cp),
        ),
    )(adj_bf, s2, b2p)

    return out[:n, :nclass]


def init_gcn_params(key, nfeat, nhid, nclass):
    """Deterministic init mimicking GraphConvolution.reset_parameters
    (uniform in +/- 1/sqrt(out_features))."""
    k1, k2, k3, k4 = jax.random.split(key, 4)
    s1 = 1.0 / jnp.sqrt(jnp.float32(nhid))
    s2 = 1.0 / jnp.sqrt(jnp.float32(nclass))
    w1 = jax.random.uniform(k1, (nfeat, nhid), jnp.float32, -s1, s1)
    b1 = jax.random.uniform(k2, (1, nhid), jnp.float32, -s1, s1)
    w2 = jax.random.uniform(k3, (nhid, nclass), jnp.float32, -s2, s2)
    b2 = jax.random.uniform(k4, (1, nclass), jnp.float32, -s2, s2)
    return w1, b1, w2, b2


if __name__ == "__main__":
    key = jax.random.PRNGKey(0)
    kx, kadj, kp = jax.random.split(key, 3)

    n_nodes, nfeat, nhid, nclass = 64, 32, 32, 8

    x = jax.random.normal(kx, (n_nodes, nfeat), jnp.float32)

    # Symmetric, self-looped, row-normalized adjacency (typical GCN input).
    a = (jax.random.uniform(kadj, (n_nodes, n_nodes)) < 0.1).astype(jnp.float32)
    a = jnp.maximum(a, a.T) + jnp.eye(n_nodes, dtype=jnp.float32)
    adj = a / jnp.sum(a, axis=1, keepdims=True)

    w1, b1, w2, b2 = init_gcn_params(kp, nfeat, nhid, nclass)

    out = jax.block_until_ready(gcn_forward(x, adj, w1, b1, w2, b2))

    # sanity: log_softmax rows should sum (in prob space) to ~1
    assert out.shape == (n_nodes, nclass)
    row_sums = jnp.exp(out).sum(axis=1)
    assert bool(jnp.all(jnp.abs(row_sums - 1.0) < 1e-3))

    print("KERNEL_OK")
</pallas_src>

<mosaic_0001>
module attributes {stable_mosaic.version = 11 : i64} {
  func.func @layer1_kernel(%arg0: i32, %arg1: memref<64x64xbf16, #tpu.memory_space<vmem>>, %arg2: memref<64x128xbf16, #tpu.memory_space<vmem>>, %arg3: memref<1x128xf32, #tpu.memory_space<vmem>>, %arg4: memref<128x128xbf16, #tpu.memory_space<vmem>>, %arg5: memref<64x128xbf16, #tpu.memory_space<vmem>>) attributes {dimension_semantics = [#tpu.dimension_semantics<parallel>], iteration_bounds = array<i64: 1>, scalar_prefetch = 0 : i64, scratch_operands = 0 : i64, tpu.core_type = #tpu.core_type<tc>, window_params = [{transform_indices = @transform_0, window_bounds = array<i64: 64, 64>}, {pipeline_mode = #tpu.pipeline_mode<synchronous>, transform_indices = @transform_1, window_bounds = array<i64: 64, 128>}, {pipeline_mode = #tpu.pipeline_mode<synchronous>, transform_indices = @transform_2, window_bounds = array<i64: 1, 128>}, {pipeline_mode = #tpu.pipeline_mode<synchronous>, transform_indices = @transform_3, window_bounds = array<i64: 128, 128>}, {transform_indices = @transform_4, window_bounds = array<i64: 64, 128>}]} {
    %c0 = arith.constant 0 : index
    %c0_0 = arith.constant 0 : index
    %0 = vector.load %arg1[%c0, %c0_0] : memref<64x64xbf16, #tpu.memory_space<vmem>>, vector<64x64xbf16>
    %c0_1 = arith.constant 0 : index
    %c0_2 = arith.constant 0 : index
    %1 = vector.load %arg2[%c0_1, %c0_2] : memref<64x128xbf16, #tpu.memory_space<vmem>>, vector<64x128xbf16>
    %cst = arith.constant dense<0.000000e+00> : vector<64x128xf32>
    %2 = tpu.matmul %0, %1, %cst {dimension_numbers = #tpu.dot_dimension_numbers<[1], [0], [0], [1], [0, 0, 1, 1], [], []>} : vector<64x64xbf16>, vector<64x128xbf16>, vector<64x128xf32> -> vector<64x128xf32>
    %c0_3 = arith.constant 0 : index
    %c0_4 = arith.constant 0 : index
    %3 = vector.load %arg3[%c0_3, %c0_4] : memref<1x128xf32, #tpu.memory_space<vmem>>, vector<1x128xf32>
    %4 = vector.broadcast %3 : vector<1x128xf32> to vector<64x128xf32>
    %5 = arith.addf %2, %4 : vector<64x128xf32>
    %cst_5 = arith.constant 0.000000e+00 : f32
    %6 = vector.broadcast %cst_5 : f32 to vector<64x128xf32>
    %7 = arith.maximumf %5, %6 : vector<64x128xf32>
    %8 = arith.truncf %7 : vector<64x128xf32> to vector<64x128xbf16>
    %c0_6 = arith.constant 0 : index
    %c0_7 = arith.constant 0 : index
    %9 = vector.load %arg4[%c0_6, %c0_7] : memref<128x128xbf16, #tpu.memory_space<vmem>>, vector<128x128xbf16>
    %cst_8 = arith.constant dense<0.000000e+00> : vector<64x128xf32>
    %10 = tpu.matmul %8, %9, %cst_8 {dimension_numbers = #tpu.dot_dimension_numbers<[1], [0], [0], [1], [0, 0, 1, 1], [], []>} : vector<64x128xbf16>, vector<128x128xbf16>, vector<64x128xf32> -> vector<64x128xf32>
    %11 = arith.truncf %10 : vector<64x128xf32> to vector<64x128xbf16>
    %c0_9 = arith.constant 0 : index
    %c0_10 = arith.constant 0 : index
    %12 = vector.load %arg5[%c0_9, %c0_10] : memref<64x128xbf16, #tpu.memory_space<vmem>>, vector<64x128xbf16>
    tpu.vector_store %arg5[%c0_9, %c0_10], %11 {strides = array<i32>} : memref<64x128xbf16, #tpu.memory_space<vmem>>, vector<64x128xbf16>,
    return
  }
  func.func @transform_0(%arg0: i32) -> (i32, i32) {
    %c0_i32 = arith.constant 0 : i32
    %c0_i32_0 = arith.constant 0 : i32
    return %arg0, %c0_i32 : i32, i32
  }
  func.func @transform_1(%arg0: i32) -> (i32, i32) {
    %c0_i32 = arith.constant 0 : i32
    %c0_i32_0 = arith.constant 0 : i32
    %c0_i32_1 = arith.constant 0 : i32
    return %c0_i32, %c0_i32_0 : i32, i32
  }
  func.func @transform_2(%arg0: i32) -> (i32, i32) {
    %c0_i32 = arith.constant 0 : i32
    %c0_i32_0 = arith.constant 0 : i32
    %c0_i32_1 = arith.constant 0 : i32
    return %c0_i32, %c0_i32_0 : i32, i32
  }
  func.func @transform_3(%arg0: i32) -> (i32, i32) {
    %c0_i32 = arith.constant 0 : i32
    %c0_i32_0 = arith.constant 0 : i32
    %c0_i32_1 = arith.constant 0 : i32
    return %c0_i32, %c0_i32_0 : i32, i32
  }
  func.func @transform_4(%arg0: i32) -> (i32, i32) {
    %c0_i32 = arith.constant 0 : i32
    %c0_i32_0 = arith.constant 0 : i32
    return %arg0, %c0_i32 : i32, i32
  }
}

module attributes {stable_mosaic.version = 11 : i64} {
  func.func @support1_kernel(%arg0: i32, %arg1: memref<64x32xbf16, #tpu.memory_space<vmem>>, %arg2: memref<32x128xbf16, #tpu.memory_space<vmem>>, %arg3: memref<64x128xbf16, #tpu.memory_space<vmem>>) attributes {dimension_semantics = [#tpu.dimension_semantics<parallel>], iteration_bounds = array<i64: 1>, scalar_prefetch = 0 : i64, scratch_operands = 0 : i64, tpu.core_type = #tpu.core_type<tc>, window_params = [{transform_indices = @transform_0, window_bounds = array<i64: 64, 32>}, {pipeline_mode = #tpu.pipeline_mode<synchronous>, transform_indices = @transform_1, window_bounds = array<i64: 32, 128>}, {transform_indices = @transform_2, window_bounds = array<i64: 64, 128>}]} {
    %c0 = arith.constant 0 : index
    %c0_0 = arith.constant 0 : index
    %0 = vector.load %arg1[%c0, %c0_0] : memref<64x32xbf16, #tpu.memory_space<vmem>>, vector<64x32xbf16>
    %c0_1 = arith.constant 0 : index
    %c0_2 = arith.constant 0 : index
    %1 = vector.load %arg2[%c0_1, %c0_2] : memref<32x128xbf16, #tpu.memory_space<vmem>>, vector<32x128xbf16>
    %cst = arith.constant dense<0.000000e+00> : vector<64x128xf32>
    %2 = tpu.matmul %0, %1, %cst {dimension_numbers = #tpu.dot_dimension_numbers<[1], [0], [0], [1], [0, 0, 1, 1], [], []>} : vector<64x32xbf16>, vector<32x128xbf16>, vector<64x128xf32> -> vector<64x128xf32>
    %3 = arith.truncf %2 : vector<64x128xf32> to vector<64x128xbf16>
    %c0_3 = arith.constant 0 : index
    %c0_4 = arith.constant 0 : index
    %4 = vector.load %arg3[%c0_3, %c0_4] : memref<64x128xbf16, #tpu.memory_space<vmem>>, vector<64x128xbf16>
    tpu.vector_store %arg3[%c0_3, %c0_4], %3 {strides = array<i32>} : memref<64x128xbf16, #tpu.memory_space<vmem>>, vector<64x128xbf16>,
    return
  }
  func.func @transform_0(%arg0: i32) -> (i32, i32) {
    %c0_i32 = arith.constant 0 : i32
    %c0_i32_0 = arith.constant 0 : i32
    return %arg0, %c0_i32 : i32, i32
  }
  func.func @transform_1(%arg0: i32) -> (i32, i32) {
    %c0_i32 = arith.constant 0 : i32
    %c0_i32_0 = arith.constant 0 : i32
    %c0_i32_1 = arith.constant 0 : i32
    return %c0_i32, %c0_i32_0 : i32, i32
  }
  func.func @transform_2(%arg0: i32) -> (i32, i32) {
    %c0_i32 = arith.constant 0 : i32
    %c0_i32_0 = arith.constant 0 : i32
    return %arg0, %c0_i32 : i32, i32
  }
}

module attributes {stable_mosaic.version = 11 : i64} {
  func.func @layer2_kernel(%arg0: i32, %arg1: memref<64x64xbf16, #tpu.memory_space<vmem>>, %arg2: memref<64x128xbf16, #tpu.memory_space<vmem>>, %arg3: memref<1x128xf32, #tpu.memory_space<vmem>>, %arg4: memref<64x128xf32, #tpu.memory_space<vmem>>) attributes {dimension_semantics = [#tpu.dimension_semantics<parallel>], iteration_bounds = array<i64: 1>, scalar_prefetch = 0 : i64, scratch_operands = 0 : i64, tpu.core_type = #tpu.core_type<tc>, window_params = [{transform_indices = @transform_0, window_bounds = array<i64: 64, 64>}, {pipeline_mode = #tpu.pipeline_mode<synchronous>, transform_indices = @transform_1, window_bounds = array<i64: 64, 128>}, {pipeline_mode = #tpu.pipeline_mode<synchronous>, transform_indices = @transform_2, window_bounds = array<i64: 1, 128>}, {transform_indices = @transform_3, window_bounds = array<i64: 64, 128>}]} {
    %c0 = arith.constant 0 : index
    %c0_0 = arith.constant 0 : index
    %0 = vector.load %arg1[%c0, %c0_0] : memref<64x64xbf16, #tpu.memory_space<vmem>>, vector<64x64xbf16>
    %c0_1 = arith.constant 0 : index
    %c0_2 = arith.constant 0 : index
    %1 = vector.load %arg2[%c0_1, %c0_2] : memref<64x128xbf16, #tpu.memory_space<vmem>>, vector<64x128xbf16>
    %cst = arith.constant dense<0.000000e+00> : vector<64x128xf32>
    %2 = tpu.matmul %0, %1, %cst {dimension_numbers = #tpu.dot_dimension_numbers<[1], [0], [0], [1], [0, 0, 1, 1], [], []>} : vector<64x64xbf16>, vector<64x128xbf16>, vector<64x128xf32> -> vector<64x128xf32>
    %c0_3 = arith.constant 0 : index
    %c0_4 = arith.constant 0 : index
    %3 = vector.load %arg3[%c0_3, %c0_4] : memref<1x128xf32, #tpu.memory_space<vmem>>, vector<1x128xf32>
    %4 = vector.broadcast %3 : vector<1x128xf32> to vector<64x128xf32>
    %5 = arith.addf %2, %4 : vector<64x128xf32>
    %6 = tpu.iota {dimensions = array<i32: 1>} : vector<64x128xi32>
    %c8_i32 = arith.constant 8 : i32
    %7 = vector.broadcast %c8_i32 : i32 to vector<64x128xi32>
    %8 = arith.cmpi slt, %6, %7 : vector<64x128xi32>
    %cst_5 = arith.constant 0xFF800000 : f32
    %9 = vector.broadcast %cst_5 : f32 to vector<64x128xf32>
    %10 = arith.select %8, %5, %9 : vector<64x128xi1>, vector<64x128xf32>
    %cst_6 = arith.constant dense<0xFF800000> : vector<64xf32>
    %11 = vector.multi_reduction <maximumf>, %10, %cst_6 [1] : vector<64x128xf32> to vector<64xf32>
    %12 = vector.shape_cast %11 : vector<64xf32> to vector<64x1xf32>
    %13 = vector.broadcast %12 : vector<64x1xf32> to vector<64x128xf32>
    %14 = arith.subf %10, %13 : vector<64x128xf32>
    %15 = math.exp %14 : vector<64x128xf32>
    %cst_7 = arith.constant dense<0.000000e+00> : vector<64xf32>
    %16 = vector.multi_reduction <add>, %15, %cst_7 [1] : vector<64x128xf32> to vector<64xf32>
    %17 = vector.shape_cast %16 : vector<64xf32> to vector<64x1xf32>
    %18 = math.log %17 : vector<64x1xf32>
    %19 = vector.broadcast %18 : vector<64x1xf32> to vector<64x128xf32>
    %20 = arith.subf %14, %19 : vector<64x128xf32>
    %c0_8 = arith.constant 0 : index
    %c0_9 = arith.constant 0 : index
    %21 = vector.load %arg4[%c0_8, %c0_9] : memref<64x128xf32, #tpu.memory_space<vmem>>, vector<64x128xf32>
    tpu.vector_store %arg4[%c0_8, %c0_9], %20 {strides = array<i32>} : memref<64x128xf32, #tpu.memory_space<vmem>>, vector<64x128xf32>,
    return
  }
  func.func @transform_0(%arg0: i32) -> (i32, i32) {
    %c0_i32 = arith.constant 0 : i32
    %c0_i32_0 = arith.constant 0 : i32
    return %arg0, %c0_i32 : i32, i32
  }
  func.func @transform_1(%arg0: i32) -> (i32, i32) {
    %c0_i32 = arith.constant 0 : i32
    %c0_i32_0 = arith.constant 0 : i32
    %c0_i32_1 = arith.constant 0 : i32
    return %c0_i32, %c0_i32_0 : i32, i32
  }
  func.func @transform_2(%arg0: i32) -> (i32, i32) {
    %c0_i32 = arith.constant 0 : i32
    %c0_i32_0 = arith.constant 0 : i32
    %c0_i32_1 = arith.constant 0 : i32
    return %c0_i32, %c0_i32_0 : i32, i32
  }
  func.func @transform_3(%arg0: i32) -> (i32, i32) {
    %c0_i32 = arith.constant 0 : i32
    %c0_i32_0 = arith.constant 0 : i32
    return %arg0, %c0_i32 : i32, i32
  }
}

</mosaic_0001>

<bundles_post_ra>
// kernel: gcn_forward.3
= control target key start
LH: loop header
LB: loop body
LE: loop exit
PB: predicated region body
PF: predicated region fallthrough
CT: control target
= control target key end

     0   :  { %vm56_vm0 = vcmask 261120   ;;  %s226_s1 = inlined_call_operand.vmem [shape: bf16[32,128], index: 1, kind: input, shape index: {}]   ;;  %s227_s0 = inlined_call_operand.vmem [shape: bf16[64,32], index: 0, kind: input, shape index: {}]   ;;  %s228_s2 = inlined_call_operand.vmem [shape: bf16[64,128], index: 2, kind: output, shape index: {}]  }
   0x1   :  { %v151_v0 = vld [vmem:[%s226_s1 + $0x8] sm:$0xff]  ;;  %v150_v1 = vld [vmem:[%s226_s1] sm:$0xff]  ;;  %v148_v4 = vld [vmem:[%s227_s0 + $0x10] sm:$0xff] }
   0x2   :  { %75 = vmatpush.bf16.msra.mxu0 %v151_v0  ;;  %175 = vmatpush.bf16.msra.mxu1 %v151_v0  ;;  %v146_v2 = vld [vmem:[%s227_s0] sm:$0xff]  ;;  %v147_v3 = vld [vmem:[%s227_s0 + $0x8] sm:$0xff]  ;;  %v149_v5 = vld [vmem:[%s227_s0 + $0x18] sm:$0xff] }
   0x3   :  { %176 = vmatpush.bf16.msra.mxu2 %v151_v0  ;;  %177 = vmatpush.bf16.msra.mxu3 %v151_v0 }
   0x6   :  { %76 = vmatpush.bf16.msra.mxu0 %v150_v1  ;;  %178 = vmatpush.bf16.msra.mxu1 %v150_v1 }
   0x7   :  { %179 = vmatpush.bf16.msra.mxu2 %v150_v1  ;;  %180 = vmatpush.bf16.msra.mxu3 %v150_v1 }
   0x9   :  { %142 = vmatmul.msk.bf16.vlgmr.msra.gmra.mxu0 %vm56_vm0, %v146_v2  ;;  %143 = vmatmul.msk.bf16.vlgmr.msra.gmra.mxu1 %vm56_vm0, %v147_v3 }
   0xa   :  { %144 = vmatmul.msk.bf16.vlgmr.msra.gmra.mxu2 %vm56_vm0, %v148_v4  ;;  %145 = vmatmul.msk.bf16.vlgmr.msra.gmra.mxu3 %vm56_vm0, %v149_v5 }
  0x86   :  { %v78_v6 = vpop.f32.mrf.mxu0  ;;  %v83_v7 = vpop.f32.mrf.mxu1 }
  0x8d   :  { %v88_v8 = vpop.f32.mrf.mxu2  ;;  %v93_v9 = vpop.f32.mrf.mxu3 }
  0x8e   :  { %v80_v10 = vpop.f32.mrf.mxu0  ;;  %v85_v11 = vpop.f32.mrf.mxu1 }
  0x8f   :  { %v155_v12 = vpack.c.bf16 %v80_v10, %v78_v6  ;;  %v160_v13 = vpack.c.bf16 %v85_v11, %v83_v7 }
  0x91   :  { %156 = vst [vmem:[%s228_s2] sm:$0xff] %v155_v12  }
  0x92   :  { %172 = vst [vmem:[%s228_s2 + $0x8] sm:$0xff] %v160_v13  }
  0x95   :  { %v90_v14 = vpop.f32.mrf.mxu2  ;;  %v95_v15 = vpop.f32.mrf.mxu3 }
  0x96   :  { %v165_v16 = vpack.c.bf16 %v90_v14, %v88_v8  ;;  %v170_v17 = vpack.c.bf16 %v95_v15, %v93_v9 }
  0x98   :  { %173 = vst [vmem:[%s228_s2 + $0x10] sm:$0xff] %v165_v16  }
  0x99   :  { %174 = vst [vmem:[%s228_s2 + $0x18] sm:$0xff] %v170_v17  }

// kernel: gcn_forward.4
= control target key start
LH: loop header
LB: loop body
LE: loop exit
PB: predicated region body
PF: predicated region fallthrough
CT: control target
= control target key end

     0   :  { %vm82_vm0 = vcmask 523264   ;;  %s461_s1 = inlined_call_operand.vmem [shape: bf16[64,128], index: 1, kind: input, shape index: {}]   ;;  %s462_s2 = inlined_call_operand.vmem [shape: f32[1,128], index: 2, kind: input, shape index: {}]   ;;  %s463_s0 = inlined_call_operand.vmem [shape: bf16[64,64], index: 0, kind: input, shape index: {}]   ;;  %s464_s3 = inlined_call_operand.vmem [shape: bf16[128,128], index: 3, kind: input, shape index: {}]   ;;  %s465_s4 = inlined_call_operand.vmem [shape: bf16[64,128], index: 4, kind: output, shape index: {}]  }
   0x1   :  { %v324_v0 = vld [vmem:[%s461_s1 + $0x18] sm:$0xff]  ;;  %v323_v1 = vld [vmem:[%s461_s1 + $0x10] sm:$0xff]  ;;  %v322_v2 = vld [vmem:[%s461_s1 + $0x8] sm:$0xff] }
   0x2   :  { %99 = vmatpush.bf16.msra.mxu0 %v324_v0  ;;  %356 = vmatpush.bf16.msra.mxu3 %v324_v0  ;;  %v321_v3 = vld [vmem:[%s461_s1] sm:$0xff]  ;;  %v318_v5 = vld [vmem:[%s463_s0 + $0x8] sm:$0xff]  ;;  %v332_v6 = vld [vmem:[%s464_s3 + $0x38] sm:$0xff] }
   0x3   :  { %v317_v4 = vld [vmem:[%s463_s0] sm:$0xff]  ;;  %200 = vmatpush.bf16.msra.mxu1 %v332_v6  ;;  %v331_v7 = vld [vmem:[%s464_s3 + $0x30] sm:$0xff]  ;;  %360 = vmatpush.bf16.msra.mxu2 %v332_v6  ;;  %v330_v8 = vld [vmem:[%s464_s3 + $0x28] sm:$0xff] }
   0x4   :  { %v329_v9 = vld [vmem:[%s464_s3 + $0x20] sm:$0xff]  ;;  %v319_v10 = vld [vmem:[%s463_s0 + $0x10] sm:$0xff]  ;;  %v320_v11 = vld [vmem:[%s463_s0 + $0x18] sm:$0xff] }
   0x5   :  { %v328_v12 = vld [vmem:[%s464_s3 + $0x18] sm:$0xff]  ;;  %v327_v13 = vld [vmem:[%s464_s3 + $0x10] sm:$0xff]  ;;  %v326_v14 = vld [vmem:[%s464_s3 + $0x8] sm:$0xff] }
   0x6   :  { %100 = vmatpush.bf16.msra.mxu0 %v323_v1  ;;  %357 = vmatpush.bf16.msra.mxu3 %v323_v1  ;;  %v325_v15 = vld [vmem:[%s464_s3] sm:$0xff] }
   0x7   :  { %201 = vmatpush.bf16.msra.mxu1 %v331_v7  ;;  %361 = vmatpush.bf16.msra.mxu2 %v331_v7  ;;  %v368_v17 = vld [vmem:[%s462_s2] ss:$0 sm:$0xff] }
   0xa   :  { %101 = vmatpush.bf16.msra.mxu0 %v322_v2  ;;  %358 = vmatpush.bf16.msra.mxu3 %v322_v2 }
   0xb   :  { %202 = vmatpush.bf16.msra.mxu1 %v330_v8  ;;  %362 = vmatpush.bf16.msra.mxu2 %v330_v8 }
   0xe   :  { %102 = vmatpush.bf16.msra.mxu0 %v321_v3  ;;  %359 = vmatpush.bf16.msra.mxu3 %v321_v3 }
   0xf   :  { %203 = vmatpush.bf16.msra.mxu1 %v329_v9  ;;  %363 = vmatpush.bf16.msra.mxu2 %v329_v9 }
  0x11   :  { %281 = vmatmul.msk.bf16.vlgmr.msra.gmra.mxu0 %vm82_vm0, %v317_v4  ;;  %282 = vmatmul.msk.bf16.vlgmr.msra.gmra.mxu3 %vm82_vm0, %v318_v5 }
  0x13   :  { %204 = vmatpush.bf16.msra.mxu1 %v328_v12  ;;  %364 = vmatpush.bf16.msra.mxu2 %v328_v12 }
  0x17   :  { %205 = vmatpush.bf16.msra.mxu1 %v327_v13  ;;  %365 = vmatpush.bf16.msra.mxu2 %v327_v13 }
  0x1b   :  { %206 = vmatpush.bf16.msra.mxu1 %v326_v14  ;;  %366 = vmatpush.bf16.msra.mxu2 %v326_v14 }
  0x1f   :  { %207 = vmatpush.bf16.msra.mxu1 %v325_v15  ;;  %367 = vmatpush.bf16.msra.mxu2 %v325_v15 }
  0x21   :  { %283 = vmatmul.msk.bf16.gmra.mxu3 %vm82_vm0, %v319_v10 }
  0x31   :  { %284 = vmatmul.msk.bf16.gmra.mxu3 %vm82_vm0, %v320_v11 }
  0x8e   :  { %v104_v16 = vpop.f32.mrf.mxu0 }
  0x8f   :  { %v105_v18 = vadd.f32 %v368_v17, %v104_v16 }
  0x91   :  { %v124_v21 = vmax.f32 %v105_v18, 0.0 }
  0x94   :  { %v109_v19 = vpop.f32.mrf.mxu3 }
  0x95   :  { %v110_v28 = vadd.f32 %v368_v17, %v109_v19 }
  0x96   :  { %v106_v20 = vpop.f32.mrf.mxu0 }
  0x97   :  { %v107_v22 = vadd.f32 %v368_v17, %v106_v20  ;;  %v126_v30 = vmax.f32 %v110_v28, 0.0 }
  0x99   :  { %v125_v23 = vmax.f32 %v107_v22, 0.0 }
  0x9b   :  { %v132_v24 = vpack.c.bf16 %v125_v23, %v124_v21 }
  0x9c   :  { %v111_v25 = vpop.f32.mrf.mxu3 }
  0x9d   :  { %208 = vmatmul.bf16.vlgmr.msra.gmra.mxu1 %v132_v24  ;;  %v112_v26 = vadd.f32 %v368_v17, %v111_v25 }
  0x9f   :  { %v127_v29 = vmax.f32 %v112_v26, 0.0 }
  0xa1   :  { %v133_v32 = vpack.c.bf16 %v127_v29, %v126_v30 }
  0xa4   :  { %v114_v27 = vpop.f32.mrf.mxu3 }
  0xa5   :  { %v115_v31 = vadd.f32 %v368_v17, %v114_v27 }
  0xa7   :  { %v128_v35 = vmax.f32 %v115_v31, 0.0 }
  0xac   :  { %v116_v33 = vpop.f32.mrf.mxu3 }
  0xad   :  { %v117_v34 = vadd.f32 %v368_v17, %v116_v33  ;;  %213 = vmatmul.bf16.gmra.mxu1 %v133_v32 }
  0xaf   :  { %v129_v36 = vmax.f32 %v117_v34, 0.0 }
  0xb1   :  { %v134_v37 = vpack.c.bf16 %v129_v36, %v128_v35 }
  0xb3   :  { %218 = vmatmul.bf16.vlgmr.msra.gmra.mxu2 %v134_v37 }
  0xb4   :  { %v119_v38 = vpop.f32.mrf.mxu3 }
  0xb5   :  { %v120_v39 = vadd.f32 %v368_v17, %v119_v38 }
  0xb7   :  { %v130_v42 = vmax.f32 %v120_v39, 0.0 }
  0xbc   :  { %v121_v40 = vpop.f32.mrf.mxu3 }
  0xbd   :  { %v122_v41 = vadd.f32 %v368_v17, %v121_v40 }
  0xbf   :  { %v131_v43 = vmax.f32 %v122_v41, 0.0 }
  0xc1   :  { %v135_v44 = vpack.c.bf16 %v131_v43, %v130_v42 }
  0xc3   :  { %223 = vmatmul.bf16.gmra.mxu2 %v135_v44 }
 0x11a   :  { %v209_v45 = vpop.f32.mrf.mxu1 }
 0x122   :  { %v211_v46 = vpop.f32.mrf.mxu1 }
 0x123   :  { %v336_v47 = vpack.c.bf16 %v211_v46, %v209_v45 }
 0x125   :  { %337 = vst [vmem:[%s465_s4] sm:$0xff] %v336_v47  }
 0x12a   :  { %v214_v48 = vpop.f32.mrf.mxu1 }
 0x132   :  { %v216_v49 = vpop.f32.mrf.mxu1 }
 0x133   :  { %v341_v50 = vpack.c.bf16 %v216_v49, %v214_v48 }
 0x135   :  { %353 = vst [vmem:[%s465_s4 + $0x8] sm:$0xff] %v341_v50  }
 0x136   :  { %v219_v51 = vpop.f32.mrf.mxu2 }
 0x13e   :  { %v221_v52 = vpop.f32.mrf.mxu2 }
 0x13f   :  { %v346_v53 = vpack.c.bf16 %v221_v52, %v219_v51 }
 0x141   :  { %354 = vst [vmem:[%s465_s4 + $0x10] sm:$0xff] %v346_v53  }
 0x146   :  { %v224_v54 = vpop.f32.mrf.mxu2 }
 0x14e   :  { %v226_v55 = vpop.f32.mrf.mxu2 }
 0x14f   :  { %v351_v56 = vpack.c.bf16 %v226_v55, %v224_v54 }
 0x151   :  { %355 = vst [vmem:[%s465_s4 + $0x18] sm:$0xff] %v351_v56  }

// kernel: gcn_forward.5
= control target key start
LH: loop header
LB: loop body
LE: loop exit
PB: predicated region body
PF: predicated region fallthrough
CT: control target
= control target key end

     0   :  { %vm79_vm0 = vcmask 523264   ;;  %v121_v8 = vlaneseq  ;;  %s412_s1 = inlined_call_operand.vmem [shape: bf16[64,128], index: 1, kind: input, shape index: {}]   ;;  %s413_s2 = inlined_call_operand.vmem [shape: f32[1,128], index: 2, kind: input, shape index: {}]   ;;  %s414_s0 = inlined_call_operand.vmem [shape: bf16[64,64], index: 0, kind: input, shape index: {}]   ;;  %s415_s3 = inlined_call_operand.vmem [shape: f32[64,128], index: 3, kind: output, shape index: {}]  }
   0x1   :  { %v267_v0 = vld [vmem:[%s412_s1 + $0x18] sm:$0xff]  ;;  %v266_v1 = vld [vmem:[%s412_s1 + $0x10] sm:$0xff]  ;;  %v265_v2 = vld [vmem:[%s412_s1 + $0x8] sm:$0xff] }
   0x2   :  { %96 = vmatpush.bf16.msra.mxu0 %v267_v0  ;;  %268 = vmatpush.bf16.msra.mxu1 %v267_v0  ;;  %v264_v3 = vld [vmem:[%s412_s1] sm:$0xff]  ;;  %v261_v5 = vld [vmem:[%s414_s0 + $0x8] sm:$0xff]  ;;  %v262_v6 = vld [vmem:[%s414_s0 + $0x10] sm:$0xff]  ;;  %v122_v9 = vand.u32 127, %v121_v8 }
   0x3   :  { %269 = vmatpush.bf16.msra.mxu2 %v267_v0  ;;  %270 = vmatpush.bf16.msra.mxu3 %v267_v0  ;;  %v260_v4 = vld [vmem:[%s414_s0] sm:$0xff]  ;;  %v263_v7 = vld [vmem:[%s414_s0 + $0x18] sm:$0xff] }
   0x4   :  { %v280_v10 = vld [vmem:[%s413_s2] ss:$0 sm:$0xff]  ;;  %vm123_vm1 = vcmp.lt.s32.totalorder %v122_v9, 8 }
   0x6   :  { %97 = vmatpush.bf16.msra.mxu0 %v266_v1  ;;  %271 = vmatpush.bf16.msra.mxu1 %v266_v1 }
   0x7   :  { %272 = vmatpush.bf16.msra.mxu2 %v266_v1  ;;  %273 = vmatpush.bf16.msra.mxu3 %v266_v1 }
   0xa   :  { %98 = vmatpush.bf16.msra.mxu0 %v265_v2  ;;  %274 = vmatpush.bf16.msra.mxu1 %v265_v2 }
   0xb   :  { %275 = vmatpush.bf16.msra.mxu2 %v265_v2  ;;  %276 = vmatpush.bf16.msra.mxu3 %v265_v2 }
   0xe   :  { %99 = vmatpush.bf16.msra.mxu0 %v264_v3  ;;  %277 = vmatpush.bf16.msra.mxu1 %v264_v3 }
   0xf   :  { %278 = vmatpush.bf16.msra.mxu2 %v264_v3  ;;  %279 = vmatpush.bf16.msra.mxu3 %v264_v3 }
  0x11   :  { %256 = vmatmul.msk.bf16.vlgmr.msra.gmra.mxu0 %vm79_vm0, %v260_v4  ;;  %257 = vmatmul.msk.bf16.vlgmr.msra.gmra.mxu1 %vm79_vm0, %v261_v5 }
  0x12   :  { %258 = vmatmul.msk.bf16.vlgmr.msra.gmra.mxu2 %vm79_vm0, %v262_v6  ;;  %259 = vmatmul.msk.bf16.vlgmr.msra.gmra.mxu3 %vm79_vm0, %v263_v7 }
  0x8e   :  { %v101_v11 = vpop.f32.mrf.mxu0  ;;  %v106_v12 = vpop.f32.mrf.mxu1 }
  0x8f   :  { %v102_v13 = vadd.f32 %v280_v10, %v101_v11  ;;  %v107_v14 = vadd.f32 %v280_v10, %v106_v12 }
  0x91   :  { %v126_v15 = vsel %vm123_vm1, %v107_v14, -inf  ;;  %v124_v16 = vsel %vm123_vm1, %v102_v13, -inf }
  0x92   :  { %136 = vmax.xlane.f32.xlu1 %v126_v15  ;;  %132 = vmax.xlane.f32.xlu0 %v124_v16 }
  0x95   :  { %v111_v17 = vpop.f32.mrf.mxu2  ;;  %v116_v18 = vpop.f32.mrf.mxu3 }
  0x96   :  { %v112_v19 = vadd.f32 %v280_v10, %v111_v17  ;;  %v103_v20 = vpop.f32.mrf.mxu0  ;;  %v108_v21 = vpop.f32.mrf.mxu1  ;;  %v117_v27 = vadd.f32 %v280_v10, %v116_v18 }
  0x97   :  { %v104_v22 = vadd.f32 %v280_v10, %v103_v20  ;;  %v109_v23 = vadd.f32 %v280_v10, %v108_v21 }
  0x98   :  { %v128_v24 = vsel %vm123_vm1, %v112_v19, -inf  ;;  %v130_v34 = vsel %vm123_vm1, %v117_v27, -inf }
  0x99   :  { %140 = vmax.xlane.f32.xlu2 %v128_v24  ;;  %v127_v25 = vsel %vm123_vm1, %v109_v23, -inf  ;;  %v125_v26 = vsel %vm123_vm1, %v104_v22, -inf }
  0x9a   :  { %138 = vmax.xlane.f32.xlu1 %v127_v25  ;;  %134 = vmax.xlane.f32.xlu0 %v125_v26 }
  0x9d   :  { %v113_v28 = vpop.f32.mrf.mxu2  ;;  %v118_v29 = vpop.f32.mrf.mxu3 }
  0x9e   :  { %v114_v30 = vadd.f32 %v280_v10, %v113_v28  ;;  %v119_v31 = vadd.f32 %v280_v10, %v118_v29 }
  0xa0   :  { %v129_v32 = vsel %vm123_vm1, %v114_v30, -inf  ;;  %v131_v33 = vsel %vm123_vm1, %v119_v31, -inf }
  0xa1   :  { %142 = vmax.xlane.f32.xlu2 %v129_v32 }
  0xa2   :  { %146 = vmax.xlane.f32.xlu1 %v131_v33  ;;  %144 = vmax.xlane.f32.xlu0 %v130_v34 }
 0x105   :  { %v137_v35 = vpop.xlane.xlu1 %136  ;;  %v133_v36 = vpop.xlane.xlu0 %132 }
 0x106   :  { %v150_v37 = vsub.f32 %v126_v15, %v137_v35  ;;  %v148_v38 = vsub.f32 %v124_v16, %v133_v36 }
 0x108   :  { %v160_v39 = vmul.f32 1.442695, %v150_v37  ;;  %v156_v40 = vmul.f32 1.442695, %v148_v38 }
 0x10a   :  { %281 = vpow2.f32 %v160_v39 }
 0x10b   :  { %283 = vpow2.f32 %v156_v40 }
 0x10c   :  { %v141_v41 = vpop.xlane.xlu2 %140 }
 0x10d   :  { %v368_v42 = vsub.f32 %v128_v24, %v141_v41  ;;  %v139_v43 = vpop.xlane.xlu1 %138  ;;  %v135_v44 = vpop.xlane.xlu0 %134 }
 0x10e   :  { %v370_v45 = vsub.f32 %v127_v25, %v139_v43  ;;  %v374_v49 = vsub.f32 %v125_v26, %v135_v44 }
 0x10f   :  { %v164_v46 = vmul.f32 1.442695, %v368_v42 }
 0x110   :  { %v282_v47 = vpop.eup %281  ;;  %v162_v48 = vmul.f32 1.442695, %v370_v45  ;;  %v158_v51 = vmul.f32 1.442695, %v374_v49 }
 0x111   :  { %v284_v50 = vpop.eup %283  ;;  %285 = vpow2.f32 %v164_v46  ;;  %176 = vadd.xlane.f32.xlu1 %v282_v47 }
 0x112   :  { %287 = vpow2.f32 %v162_v48  ;;  %172 = vadd.xlane.f32.xlu2 %v284_v50 }
 0x113   :  { %289 = vpow2.f32 %v158_v51 }
 0x114   :  { %v143_v52 = vpop.xlane.xlu2 %142 }
 0x115   :  { %v377_v53 = vsub.f32 %v129_v32, %v143_v52  ;;  %v145_v54 = vpop.xlane.xlu0 %144  ;;  %v147_v55 = vpop.xlane.xlu1 %146 }
 0x116   :  { %v379_v56 = vsub.f32 %v130_v34, %v145_v54  ;;  %v155_v61 = vsub.f32 %v131_v33, %v147_v55 }
 0x117   :  { %v286_v57 = vpop.eup %285  ;;  %v166_v58 = vmul.f32 1.442695, %v377_v53 }
 0x118   :  { %v288_v59 = vpop.eup %287  ;;  %v168_v60 = vmul.f32 1.442695, %v379_v56  ;;  %180 = vadd.xlane.f32.xlu0 %v286_v57  ;;  %v170_v62 = vmul.f32 1.442695, %v155_v61 }
 0x119   :  { %291 = vpow2.f32 %v166_v58  ;;  %v290_v63 = vpop.eup %289 }
 0x11a   :  { %178 = vadd.xlane.f32.xlu2 %v288_v59  ;;  %293 = vpow2.f32 %v168_v60 }
 0x11b   :  { %295 = vpow2.f32 %v170_v62 }
 0x11f   :  { %v292_v0 = vpop.eup %291 }
 0x120   :  { %182 = vadd.xlane.f32.xlu1 %v292_v0  ;;  %174 = vadd.xlane.f32.xlu0 %v290_v63  ;;  %v294_v1 = vpop.eup %293 }
 0x121   :  { %v296_v2 = vpop.eup %295 }
 0x122   :  { %184 = vadd.xlane.f32.xlu2 %v294_v1 }
 0x128   :  { %186 = vadd.xlane.f32.xlu0 %v296_v2 }
 0x184   :  { %v177_v3 = vpop.xlane.xlu1 %176 }
 0x185   :  { %297 = vlog2.f32 %v177_v3  ;;  %v173_v4 = vpop.xlane.xlu2 %172 }
 0x186   :  { %299 = vlog2.f32 %v173_v4 }
 0x18b   :  { %v298_v5 = vpop.eup %297  ;;  %v181_v6 = vpop.xlane.xlu0 %180 }
 0x18c   :  { %v300_v7 = vpop.eup %299  ;;  %v193_v8 = vmul.f32 0.6931472, %v298_v5  ;;  %301 = vlog2.f32 %v181_v6 }
 0x18d   :  { %v189_v9 = vmul.f32 0.6931472, %v300_v7  ;;  %v179_v10 = vpop.xlane.xlu2 %178 }
 0x18e   :  { %v206_v11 = vsub.f32 %v150_v37, %v193_v8  ;;  %303 = vlog2.f32 %v179_v10 }
 0x18f   :  { %v204_v12 = vsub.f32 %v148_v38, %v189_v9 }
 0x190   :  { %214 = vst [vmem:[%s415_s3 + $0x10] sm:$0xff] %v206_v11 }
 0x191   :  { %212 = vst [vmem:[%s415_s3] sm:$0xff] %v204_v12 }
 0x192   :  { %v302_v13 = vpop.eup %301 }
 0x193   :  { %v197_v14 = vmul.f32 0.6931472, %v302_v13  ;;  %v183_v15 = vpop.xlane.xlu1 %182  ;;  %v175_v16 = vpop.xlane.xlu0 %174 }
 0x194   :  { %v304_v17 = vpop.eup %303  ;;  %305 = vlog2.f32 %v183_v15 }
 0x195   :  { %v208_v18 = vsub.f32 %v368_v42, %v197_v14  ;;  %v195_v19 = vmul.f32 0.6931472, %v304_v17  ;;  %307 = vlog2.f32 %v175_v16  ;;  %v185_v20 = vpop.xlane.xlu2 %184 }
 0x196   :  { %309 = vlog2.f32 %v185_v20 }
 0x197   :  { %216 = vst [vmem:[%s415_s3 + $0x20] sm:$0xff] %v208_v18  ;;  %v207_v21 = vsub.f32 %v370_v45, %v195_v19 }
 0x199   :  { %215 = vst [vmem:[%s415_s3 + $0x18] sm:$0xff] %v207_v21 }
 0x19a   :  { %v306_v22 = vpop.eup %305 }
 0x19b   :  { %v308_v23 = vpop.eup %307  ;;  %v199_v24 = vmul.f32 0.6931472, %v306_v22  ;;  %v187_v25 = vpop.xlane.xlu0 %186 }
 0x19c   :  { %v310_v26 = vpop.eup %309  ;;  %v191_v27 = vmul.f32 0.6931472, %v308_v23  ;;  %311 = vlog2.f32 %v187_v25 }
 0x19d   :  { %v209_v28 = vsub.f32 %v377_v53, %v199_v24  ;;  %v201_v29 = vmul.f32 0.6931472, %v310_v26 }
 0x19e   :  { %v205_v30 = vsub.f32 %v374_v49, %v191_v27 }
 0x19f   :  { %217 = vst [vmem:[%s415_s3 + $0x28] sm:$0xff] %v209_v28  ;;  %v210_v31 = vsub.f32 %v379_v56, %v201_v29 }
 0x1a0   :  { %213 = vst [vmem:[%s415_s3 + $0x8] sm:$0xff] %v205_v30 }
 0x1a1   :  { %218 = vst [vmem:[%s415_s3 + $0x30] sm:$0xff] %v210_v31 }
 0x1a2   :  { %v312_v32 = vpop.eup %311 }
 0x1a3   :  { %v203_v33 = vmul.f32 0.6931472, %v312_v32 }
 0x1a5   :  { %v211_v34 = vsub.f32 %v155_v61, %v203_v33 }
 0x1a7   :  { %219 = vst [vmem:[%s415_s3 + $0x38] sm:$0xff] %v211_v34 }

</bundles_post_ra>
